<compile_context>
chip_gen: v6e
topology: v6e:2x2x1
jax: 0.10.0
libtpu: 0.0.40
codegen_flags: <defaults>
</compile_context>

<pallas_src>
import functools

import numpy as np
import jax
import jax.numpy as jnp
from jax import lax
from jax.experimental import pallas as pl
from jax.experimental.pallas import tpu as pltpu


_SPLIT = 256          # sublane height of predT / MXU M dim (full rows on v6e/v7x)
_SHIFT = 8            # log2(_SPLIT)
_MAX_R_CHUNK = 512    # per-step pred chunk: 512 * 256 * 4 B = 512 KiB


def _round_up(x, m):
    return ((x + m - 1) // m) * m


def _gather_loss_kernel(predT_ref, tgt_ref, meta_ref, out_ref, acc_ref,
                        *, L: int, r_chunk: int):
    """Grid step = (batch element b, K-chunk k).

    predT_ref : (1, 256, r_chunk) f32  chunk of transposed flattened prediction
    tgt_ref   : (1, 1, 2L) i32  flat gather indices; lanes [0,L)=birth, [L,2L)=death
    meta_ref  : (1, 1, 2L) f32  lanes [0,L)=bias, [L,2L)=scale (alpha/beta folded in)
    out_ref   : (1, 8, 128) f32 per-batch loss partial, value at [0,0,0], 0 elsewhere
    acc_ref   : (256, 2L) f32 scratch accumulating the row-gathered pred slices
    """
    k = pl.program_id(1)

    @pl.when(k == 0)
    def _():
        acc_ref[...] = jnp.zeros_like(acc_ref)

    tgt = tgt_ref[0]                                        # (1, 2L) int32 (all >= 0)
    row = tgt >> _SHIFT                                     # which 256-wide row of pred
    row_local = row - k * r_chunk                           # row within this chunk

    # Tiny row one-hot (r_chunk, 2L): rows outside this chunk simply never match.
    r_iota = lax.broadcasted_iota(jnp.int32, (r_chunk, 2 * L), 0)
    onehot = (r_iota == row_local).astype(jnp.float32)      # (r_chunk, 2L)

    # One vanilla MXU push: (256, r_chunk) x (r_chunk, 2L) -> (256, 2L).
    # 0/1 weights + f32 accumulate => gathered values are exact.
    acc_ref[...] += lax.dot_general(
        predT_ref[0], onehot, (((1,), (0,)), ((), ())),
        preferred_element_type=jnp.float32)

    @pl.when(k == pl.num_programs(1) - 1)
    def _():
        # Sublane select (tgt % 256) + cross-sublane reduce -> lane-dense (1, 2L).
        sub = tgt & (_SPLIT - 1)
        s_iota = lax.broadcasted_iota(jnp.int32, (_SPLIT, 2 * L), 0)
        sel = (s_iota == sub).astype(jnp.float32)            # (256, 2L)
        vals = jnp.sum(acc_ref[...] * sel, axis=0, keepdims=True)   # (1, 2L)

        birth = vals[:, :L]
        death = vals[:, L:]
        diff = (birth - death) ** 2                           # (1, L)

        meta = meta_ref[0]                                    # (1, 2L)
        bias = meta[:, :L]
        scale = meta[:, L:]
        # good interval : +w*beta  - w*beta    * diff
        # bad  interval :  0       + w*(1-beta)* diff
        # invalid / pad :  0       + 0
        s = jnp.sum(bias + scale * diff)                      # per-batch scalar

        mask0 = jnp.logical_and(
            lax.broadcasted_iota(jnp.int32, (8, 128), 0) == 0,
            lax.broadcasted_iota(jnp.int32, (8, 128), 1) == 0)
        out_ref[0] = mask0.astype(jnp.float32) * s


def _prep_component(idx, counts, ncomps, beta, H, W, sentinel):
    """Fold ragged metadata into flat gather indices + per-interval bias/scale."""
    B, C, _, N = idx.shape
    idx = idx.astype(jnp.int32)
    bx, by = idx[:, :, 0, :], idx[:, :, 1, :]                # (B, C, N)
    dx, dy = idx[:, :, 2, :], idx[:, :, 3, :]

    c_off = (jnp.arange(C, dtype=jnp.int32) * (H * W))[None, :, None]
    n_iota = jnp.arange(N, dtype=jnp.int32)[None, None, :]   # (1, 1, N)
    cnt = counts.astype(jnp.int32)[:, :, None]               # (B, C, 1)
    ncp = ncomps.astype(jnp.int32)[None, :, None]            # (1, C, 1)

    valid = n_iota < cnt
    good = n_iota < jnp.minimum(cnt, ncp)
    bad = jnp.logical_and(valid, jnp.logical_not(good))

    sent = jnp.int32(sentinel)
    birth = jnp.where(valid, c_off + bx * W + by, sent).reshape(B, C * N)
    death = jnp.where(valid, c_off + dx * W + dy, sent).reshape(B, C * N)

    beta = jnp.float32(beta)
    bias = jnp.where(good, beta, 0.0).astype(jnp.float32).reshape(B, C * N)
    scale = jnp.where(good, -beta,
                      jnp.where(bad, 1.0 - beta, 0.0)).astype(jnp.float32).reshape(B, C * N)
    return birth, death, bias, scale


def birth_death_interval_loss(pred,
                              idx0=None, counts0=None, ncomps0=None,
                              idx1=None, counts1=None, ncomps1=None,
                              alpha=0.5, beta=0.5):
    """Equivalent of BirthDeathIntervalLoss.forward (single fused pallas_call)."""
    B, C, H, W = pred.shape
    K = C * H * W
    sentinel = K  # lands in (or just past) the zero-padded tail of pred -> gathers 0.0

    comps = []
    if idx0 is not None:
        comps.append((idx0, counts0, ncomps0, float(alpha)))
    if idx1 is not None:
        comps.append((idx1, counts1, ncomps1, 1.0 - float(alpha)))
    if not comps:
        return jnp.float32(0.0)

    births, deaths, biases, scales = [], [], [], []
    for idx, counts, ncomps, w in comps:
        b_t, d_t, bias, scale = _prep_component(idx, counts, ncomps, beta, H, W, sentinel)
        births.append(b_t)
        deaths.append(d_t)
        biases.append(w * bias)       # alpha / (1-alpha) folded into bias & scale
        scales.append(w * scale)
    birth = jnp.concatenate(births, axis=1)
    death = jnp.concatenate(deaths, axis=1)
    bias = jnp.concatenate(biases, axis=1)
    scale = jnp.concatenate(scales, axis=1)

    # Lane-densify the interval axis (pad to a multiple of 128 lanes).
    n_int = birth.shape[1]
    L = max(128, _round_up(n_int, 128))
    pad = L - n_int
    birth = jnp.pad(birth, ((0, 0), (0, pad)), constant_values=sentinel)
    death = jnp.pad(death, ((0, 0), (0, pad)), constant_values=sentinel)
    bias = jnp.pad(bias, ((0, 0), (0, pad)))
    scale = jnp.pad(scale, ((0, 0), (0, pad)))

    tgt = jnp.concatenate([birth, death], axis=1)[:, None, :]    # (B, 1, 2L) int32
    meta = jnp.concatenate([bias, scale], axis=1)[:, None, :]    # (B, 1, 2L) f32

    # Sublane/lane-dense pred layout: predT[b, l, r] = pred_flat[b, r*256 + l].
    R = (K + _SPLIT - 1) // _SPLIT
    r_chunk = R if R <= _MAX_R_CHUNK else _MAX_R_CHUNK
    R_pad = _round_up(R, r_chunk)
    nk = R_pad // r_chunk
    K_pad = R_pad * _SPLIT

    pred_flat = pred.astype(jnp.float32).reshape(B, K)
    if K_pad > K:
        pred_flat = jnp.pad(pred_flat, ((0, 0), (0, K_pad - K)))
    predT = jnp.swapaxes(pred_flat.reshape(B, R_pad, _SPLIT), 1, 2)  # (B, 256, R_pad)

    kernel = functools.partial(_gather_loss_kernel, L=L, r_chunk=r_chunk)
    out = pl.pallas_call(
        kernel,
        out_shape=jax.ShapeDtypeStruct((B, 8, 128), jnp.float32),
        grid_spec=pltpu.PrefetchScalarGridSpec(
            num_scalar_prefetch=0,
            grid=(B, nk),
            in_specs=[
                pl.BlockSpec((1, _SPLIT, r_chunk), lambda b, k: (b, 0, k)),
                pl.BlockSpec((1, 1, 2 * L), lambda b, k: (b, 0, 0)),
                pl.BlockSpec((1, 1, 2 * L), lambda b, k: (b, 0, 0)),
            ],
            out_specs=pl.BlockSpec((1, 8, 128), lambda b, k: (b, 0, 0)),
            scratch_shapes=[pltpu.VMEM((_SPLIT, 2 * L), jnp.float32)],
        ),
        compiler_params=pltpu.CompilerParams(
            dimension_semantics=("parallel", "arbitrary")),
    )(predT, tgt, meta)

    # sum_b ( alpha * sum_c loss0_bc + (1-alpha) * sum_c loss1_bc ) / (B*C)
    return jnp.sum(out) / jnp.float32(B * C)


# ----------------------------------------------------------------------------
# pure-numpy reference (mirrors the PyTorch semantics exactly)
# ----------------------------------------------------------------------------
def _ref_component(pred, idx, counts, ncomps, beta):
    B, C = pred.shape[0], pred.shape[1]
    total = 0.0
    for b in range(B):
        s = 0.0
        for c in range(C):
            n = int(counts[b, c])
            if n > 0:
                bx, by = idx[b, c, 0, :n], idx[b, c, 1, :n]
                dx, dy = idx[b, c, 2, :n], idx[b, c, 3, :n]
                bv = pred[b, c, bx, by]
                dv = pred[b, c, dx, dy]
                diff = (bv - dv) ** 2
                ng = min(n, int(ncomps[c]))
                nb = max(n - int(ncomps[c]), 0)
                loss = beta * (1.0 - diff[:ng]).sum() if ng > 0 else 0.0
                if nb > 0:
                    loss += (1.0 - beta) * diff[ng:].sum()
                s += loss
        total += s / C
    return total / B


def _ref_forward(pred, idx0, counts0, ncomps0, idx1, counts1, ncomps1,
                 alpha, beta):
    l0 = _ref_component(pred, idx0, counts0, ncomps0, beta)
    l1 = _ref_component(pred, idx1, counts1, ncomps1, beta)
    return alpha * l0 + (1.0 - alpha) * l1


if __name__ == "__main__":
    B, C, H, W = 2, 4, 16, 16
    N_INT = 8
    alpha, beta = 0.5, 0.5

    key = jax.random.PRNGKey(0)
    k_pred, k_cnt0, k_idx0, k_cnt1, k_idx1 = jax.random.split(key, 5)

    prediction = jax.random.normal(k_pred, (B, C, H, W), dtype=jnp.float32)

    # Betti numbers (target component counts) per class, per homology dim.
    ncomps0 = jnp.array([1, 2, 1, 3], dtype=jnp.int32)   # dim-0 components
    ncomps1 = jnp.array([0, 1, 2, 1], dtype=jnp.int32)   # dim-1 components

    # Packed ragged intervals: rows are [birth_x, birth_y, death_x, death_y].
    counts0 = jax.random.randint(k_cnt0, (B, C), 0, N_INT + 1, dtype=jnp.int32)
    idx0 = jax.random.randint(k_idx0, (B, C, 4, N_INT), 0, H, dtype=jnp.int32)
    counts1 = jax.random.randint(k_cnt1, (B, C), 0, N_INT + 1, dtype=jnp.int32)
    idx1 = jax.random.randint(k_idx1, (B, C, 4, N_INT), 0, H, dtype=jnp.int32)

    total_loss = birth_death_interval_loss(
        prediction,
        idx0=idx0, counts0=counts0, ncomps0=ncomps0,
        idx1=idx1, counts1=counts1, ncomps1=ncomps1,
        alpha=alpha, beta=beta)
    total_loss = jax.block_until_ready(total_loss)

    expected = _ref_forward(np.asarray(prediction),
                            np.asarray(idx0), np.asarray(counts0), np.asarray(ncomps0),
                            np.asarray(idx1), np.asarray(counts1), np.asarray(ncomps1),
                            alpha, beta)

    np.testing.assert_allclose(np.asarray(total_loss), expected,
                               rtol=1e-5, atol=1e-5)
    print("KERNEL_OK")
</pallas_src>

<mosaic_0001>
module attributes {stable_mosaic.version = 11 : i64} {
  func.func @_gather_loss_kernel(%arg0: i32, %arg1: i32, %arg2: memref<1x256x4xf32, #tpu.memory_space<vmem>>, %arg3: memref<1x1x256xi32, #tpu.memory_space<vmem>>, %arg4: memref<1x1x256xf32, #tpu.memory_space<vmem>>, %arg5: memref<1x8x128xf32, #tpu.memory_space<vmem>>, %arg6: memref<256x256xf32, #tpu.memory_space<vmem>>) attributes {dimension_semantics = [#tpu.dimension_semantics<parallel>, #tpu.dimension_semantics<arbitrary>], iteration_bounds = array<i64: 2, 1>, scalar_prefetch = 0 : i64, scratch_operands = 1 : i64, tpu.core_type = #tpu.core_type<tc>, window_params = [{transform_indices = @transform_0, window_bounds = array<i64: 1, 256, 4>}, {transform_indices = @transform_1, window_bounds = array<i64: 1, 1, 256>}, {transform_indices = @transform_2, window_bounds = array<i64: 1, 1, 256>}, {transform_indices = @transform_3, window_bounds = array<i64: 1, 8, 128>}]} {
    %c0_i32 = arith.constant 0 : i32
    %0 = arith.cmpi eq, %arg1, %c0_i32 : i32
    %1 = arith.extui %0 : i1 to i32
    %c0_i32_0 = arith.constant 0 : i32
    %2 = arith.cmpi ne, %1, %c0_i32_0 : i32
    scf.if %2 {
      %cst_12 = arith.constant 0.000000e+00 : f32
      %24 = vector.broadcast %cst_12 : f32 to vector<256x256xf32>
      %c0_13 = arith.constant 0 : index
      %c0_14 = arith.constant 0 : index
      %25 = vector.load %arg6[%c0_13, %c0_14] : memref<256x256xf32, #tpu.memory_space<vmem>>, vector<256x256xf32>
      tpu.vector_store %arg6[%c0_13, %c0_14], %24 {strides = array<i32>} : memref<256x256xf32, #tpu.memory_space<vmem>>, vector<256x256xf32>,
    } else {
    }
    %c0 = arith.constant 0 : index
    %c0_1 = arith.constant 0 : index
    %c0_2 = arith.constant 0 : index
    %3 = vector.load %arg3[%c0, %c0_1, %c0_2] : memref<1x1x256xi32, #tpu.memory_space<vmem>>, vector<1x1x256xi32>
    %4 = vector.shape_cast %3 : vector<1x1x256xi32> to vector<1x256xi32>
    %c8_i32 = arith.constant 8 : i32
    %5 = vector.broadcast %c8_i32 : i32 to vector<1x256xi32>
    %6 = arith.shrsi %4, %5 : vector<1x256xi32>
    %c4_i32 = arith.constant 4 : i32
    %7 = arith.muli %arg1, %c4_i32 : i32
    %8 = vector.broadcast %7 : i32 to vector<1x256xi32>
    %9 = arith.subi %6, %8 : vector<1x256xi32>
    %10 = tpu.iota {dimensions = array<i32: 0>} : vector<4x256xi32>
    %11 = vector.broadcast %9 : vector<1x256xi32> to vector<4x256xi32>
    %12 = arith.cmpi eq, %10, %11 : vector<4x256xi32>
    %13 = arith.extui %12 : vector<4x256xi1> to vector<4x256xi32>
    %14 = arith.sitofp %13 : vector<4x256xi32> to vector<4x256xf32>
    %c0_3 = arith.constant 0 : index
    %c0_4 = arith.constant 0 : index
    %15 = vector.load %arg6[%c0_3, %c0_4] : memref<256x256xf32, #tpu.memory_space<vmem>>, vector<256x256xf32>
    %c0_5 = arith.constant 0 : index
    %c0_6 = arith.constant 0 : index
    %c0_7 = arith.constant 0 : index
    %16 = vector.load %arg2[%c0_5, %c0_6, %c0_7] : memref<1x256x4xf32, #tpu.memory_space<vmem>>, vector<1x256x4xf32>
    %17 = vector.shape_cast %16 : vector<1x256x4xf32> to vector<256x4xf32>
    %cst = arith.constant dense<0.000000e+00> : vector<256x256xf32>
    %18 = tpu.matmul %17, %14, %cst {dimension_numbers = #tpu.dot_dimension_numbers<[1], [0], [0], [1], [0, 0, 1, 1], [], []>} : vector<256x4xf32>, vector<4x256xf32>, vector<256x256xf32> -> vector<256x256xf32>
    %19 = arith.addf %15, %18 : vector<256x256xf32>
    %c0_8 = arith.constant 0 : index
    %c0_9 = arith.constant 0 : index
    %20 = vector.load %arg6[%c0_8, %c0_9] : memref<256x256xf32, #tpu.memory_space<vmem>>, vector<256x256xf32>
    tpu.vector_store %arg6[%c0_8, %c0_9], %19 {strides = array<i32>} : memref<256x256xf32, #tpu.memory_space<vmem>>, vector<256x256xf32>,
    %c0_i32_10 = arith.constant 0 : i32
    %21 = arith.cmpi eq, %arg1, %c0_i32_10 : i32
    %22 = arith.extui %21 : i1 to i32
    %c0_i32_11 = arith.constant 0 : i32
    %23 = arith.cmpi ne, %22, %c0_i32_11 : i32
    scf.if %23 {
      %c255_i32 = arith.constant 255 : i32
      %24 = vector.broadcast %c255_i32 : i32 to vector<1x256xi32>
      %25 = arith.andi %4, %24 : vector<1x256xi32>
      %26 = tpu.iota {dimensions = array<i32: 0>} : vector<256x256xi32>
      %27 = vector.broadcast %25 : vector<1x256xi32> to vector<256x256xi32>
      %28 = arith.cmpi eq, %26, %27 : vector<256x256xi32>
      %29 = arith.extui %28 : vector<256x256xi1> to vector<256x256xi32>
      %30 = arith.sitofp %29 : vector<256x256xi32> to vector<256x256xf32>
      %c0_12 = arith.constant 0 : index
      %c0_13 = arith.constant 0 : index
      %31 = vector.load %arg6[%c0_12, %c0_13] : memref<256x256xf32, #tpu.memory_space<vmem>>, vector<256x256xf32>
      %32 = arith.mulf %31, %30 : vector<256x256xf32>
      %cst_14 = arith.constant dense<0.000000e+00> : vector<256xf32>
      %33 = vector.multi_reduction <add>, %32, %cst_14 [0] : vector<256x256xf32> to vector<256xf32>
      %34 = vector.shape_cast %33 : vector<256xf32> to vector<1x256xf32>
      %35 = vector.extract_strided_slice %34 {offsets = [0, 0], sizes = [1, 128], strides = [1, 1]} : vector<1x256xf32> to vector<1x128xf32>
      %36 = vector.extract_strided_slice %34 {offsets = [0, 128], sizes = [1, 128], strides = [1, 1]} : vector<1x256xf32> to vector<1x128xf32>
      %37 = arith.subf %35, %36 : vector<1x128xf32>
      %38 = arith.mulf %37, %37 : vector<1x128xf32>
      %c0_15 = arith.constant 0 : index
      %c0_16 = arith.constant 0 : index
      %c0_17 = arith.constant 0 : index
      %39 = vector.load %arg4[%c0_15, %c0_16, %c0_17] : memref<1x1x256xf32, #tpu.memory_space<vmem>>, vector<1x1x256xf32>
      %40 = vector.shape_cast %39 : vector<1x1x256xf32> to vector<1x256xf32>
      %41 = vector.extract_strided_slice %40 {offsets = [0, 0], sizes = [1, 128], strides = [1, 1]} : vector<1x256xf32> to vector<1x128xf32>
      %42 = vector.extract_strided_slice %40 {offsets = [0, 128], sizes = [1, 128], strides = [1, 1]} : vector<1x256xf32> to vector<1x128xf32>
      %43 = arith.mulf %42, %38 : vector<1x128xf32>
      %44 = arith.addf %41, %43 : vector<1x128xf32>
      %45 = vector.shape_cast %44 : vector<1x128xf32> to vector<1x1x128xf32>
      %cst_18 = arith.constant dense<0.000000e+00> : vector<1xf32>
      %46 = vector.multi_reduction <add>, %45, %cst_18 [1, 2] : vector<1x1x128xf32> to vector<1xf32>
      %47 = vector.shape_cast %46 : vector<1xf32> to vector<1x1x1xf32>
      %48 = vector.extract %47[0, 0, 0] : f32 from vector<1x1x1xf32>
      %49 = tpu.iota {dimensions = array<i32: 0>} : vector<8x128xi32>
      %c0_i32_19 = arith.constant 0 : i32
      %50 = vector.broadcast %c0_i32_19 : i32 to vector<8x128xi32>
      %51 = arith.cmpi eq, %49, %50 : vector<8x128xi32>
      %52 = tpu.iota {dimensions = array<i32: 1>} : vector<8x128xi32>
      %c0_i32_20 = arith.constant 0 : i32
      %53 = vector.broadcast %c0_i32_20 : i32 to vector<8x128xi32>
      %54 = arith.cmpi eq, %52, %53 : vector<8x128xi32>
      %55 = arith.andi %51, %54 : vector<8x128xi1>
      %56 = arith.extui %55 : vector<8x128xi1> to vector<8x128xi32>
      %57 = arith.sitofp %56 : vector<8x128xi32> to vector<8x128xf32>
      %58 = vector.broadcast %48 : f32 to vector<8x128xf32>
      %59 = arith.mulf %57, %58 : vector<8x128xf32>
      %c0_21 = arith.constant 0 : index
      %c0_22 = arith.constant 0 : index
      %c0_23 = arith.constant 0 : index
      %60 = vector.load %arg5[%c0_21, %c0_22, %c0_23] : memref<1x8x128xf32, #tpu.memory_space<vmem>>, vector<1x8x128xf32>
      %61 = vector.shape_cast %60 : vector<1x8x128xf32> to vector<8x128xf32>
      %62 = vector.shape_cast %59 : vector<8x128xf32> to vector<1x8x128xf32>
      tpu.vector_store %arg5[%c0_21, %c0_22, %c0_23], %62 {strides = array<i32>} : memref<1x8x128xf32, #tpu.memory_space<vmem>>, vector<1x8x128xf32>,
    } else {
    }
    return
  }
  func.func @transform_0(%arg0: i32, %arg1: i32) -> (i32, i32, i32) {
    %c0_i32 = arith.constant 0 : i32
    %c0_i32_0 = arith.constant 0 : i32
    return %arg0, %c0_i32, %arg1 : i32, i32, i32
  }
  func.func @transform_1(%arg0: i32, %arg1: i32) -> (i32, i32, i32) {
    %c0_i32 = arith.constant 0 : i32
    %c0_i32_0 = arith.constant 0 : i32
    %c0_i32_1 = arith.constant 0 : i32
    return %arg0, %c0_i32, %c0_i32_0 : i32, i32, i32
  }
  func.func @transform_2(%arg0: i32, %arg1: i32) -> (i32, i32, i32) {
    %c0_i32 = arith.constant 0 : i32
    %c0_i32_0 = arith.constant 0 : i32
    %c0_i32_1 = arith.constant 0 : i32
    return %arg0, %c0_i32, %c0_i32_0 : i32, i32, i32
  }
  func.func @transform_3(%arg0: i32, %arg1: i32) -> (i32, i32, i32) {
    %c0_i32 = arith.constant 0 : i32
    %c0_i32_0 = arith.constant 0 : i32
    %c0_i32_1 = arith.constant 0 : i32
    return %arg0, %c0_i32, %c0_i32_0 : i32, i32, i32
  }
}

</mosaic_0001>

<bundles_post_ra>
// kernel: tpu_custom_call.1
= control target key start
LH: loop header
LB: loop body
LE: loop exit
PB: predicated region body
PF: predicated region fallthrough
CT: control target
= control target key end

     0   :  { %8 = vsyncpa [#allocation4], 0  ;;  %s2367_s0 = inlined_call_operand.vmem [shape: f32[2,256,4], index: 0, kind: input, shape index: {}]   ;;  %s2368_s1 = inlined_call_operand.vmem [shape: s32[2,1,256], index: 1, kind: input, shape index: {}]   ;;  %s2369_s2 = inlined_call_operand.vmem [shape: f32[2,1,256], index: 2, kind: input, shape index: {}]   ;;  %s2370_s3 = inlined_call_operand.hbm [shape: f32[2,8,128], index: 3, kind: output, shape index: {}]  }
   0x1   :  { %10 = vsyncpa [#allocation4 + $0x1], 0  ;;  %s1753_s12 = smov 0   ;;  %s1755_s13 = smov 0  }
   0x2   :  { %s1757_s14 = smov 0   ;;  %s1759_s15 = smov 0  }
   0x3   :  { %s1761_s16 = smov 0   ;;  %s1763_s17 = smov 0  }
   0x4 LB: > { %s1477_s18 = sadd.s32 4294967295, %s1729_s17   ;;  %s1478_s19 = sadd.s32 4294967294, %s1729_s17   ;;  %s1729_s17 = sphi %s1763_s17, %s16_s17   ;;  %s1725_s16 = sphi %s1761_s16, %s2379_s16   ;;  %s1721_s15 = sphi %s1759_s15, %s2378_s15   ;;  %s1717_s14 = sphi %s1757_s14, %s2377_s14   ;;  %s1713_s13 = sphi %s1755_s13, %s2376_s13   ;;  %s1709_s12 = sphi %s1753_s12, %s2375_s12  }
   0x5   : > { %s28_s20 = sadd.s32 1, %s1725_s16  ;;  %s115_s21 = sadd.s32 1, %s1717_s14 }
   0x6   : > { %p30_p0 = scmp.ge.s32.totalorder %s28_s20, 2  ;;  %p125_p1 = scmp.ne.s32.totalorder %s1717_s14, %s1713_s13 }
   0x7   : > { %p126_p2 = scmp.eq.s32.totalorder %s1477_s18, 1  ;;  %p131_p3 = scmp.ne.s32.totalorder %s1713_s13, %s1709_s12 }
   0x8   : > { %s2381_s20 = smov (%p30_p0, %s28_s20), 0  ;;  %p132_p5 = scmp.eq.s32.totalorder %s1478_s19, 1 }
   0x9   : > { %p1793_p4 = por %p126_p2, %p125_p1  ;;  %s112_s23 = ssub.s32 %s1725_s16, %s2381_s20 }
   0xa   : > { %p1481_p6 = scmp.ge.s32.totalorder %s1729_s17, 1  ;;  %p113_p7 = scmp.eq.s32.totalorder %s112_s23, 0 }
   0xb   : > { %p1800_p8 = por %p132_p5, %p131_p3  ;;  %p175_p9 = scmp.lt.s32.totalorder %s1729_s17, 3 }
   0xc   : > { %s1806_s25 = scalar_select %p113_p7, %s1717_s14, %s115_s21  }
   0xd   : > { %p176_p10 = pnand %p1481_p6, %p175_p9 }
   0xe   : > { %p210_p11 = scmp.lt.s32.totalorder (!%p176_p10), %s1721_s15, 1  ;;  %s207_s11 = sand.u32 (!%p176_p10), 1, %s1713_s13  }
   0xf   : > { %179 = sbr.rel (%p176_p10) target bundleno = 561 (0x231), region = 32  ;;  %s1482_s18 = sshll.u32 (!%p176_p10), %s207_s11, 3 }
  0x10   : > { %s1589_s19 = sshll.u32 (!%p176_p10), %s1721_s15, 7  ;;  %s209_s21 = scalar_lea.vmem (!%p176_p10), [#allocation3], %s1482_s18 }
  0x11   : > { %s1380_s23 = sshll.u32 (!%p176_p10), %s209_s21, 4  ;;  %s1378_s29 = scalar_lea.hbm (!%p176_p10), %s2370_s3, %s1589_s19  ;;  %s1381_s23 = int_to_ptr.vmem [resolvable:$true] %s1380_s23 }
  0x12   : > { %s1732_s5 = smov (!%p176_p10), [#allocation3]  }
  0x13   : > { %s1657_s6 = sshll.u32 (!%p176_p10), %s1732_s5, 4  ;;  %s1658_s6 = int_to_ptr.vmem [resolvable:$false] %s1657_s6 }
  0x14   : > { %v2371_v0 = vlaneseq  ;;  %v1731_v1 = vmov 0.0   ;;  %s1812_s26 = scalar_select %p210_p11, %s1721_s15, 1  ;;  %vm508_vm0 = vcmask 1043456   ;;  %vm411_vm3 = vcmask 31744  }
  0x15   : > { %579 = vmatprep.mubr.f32.mxu0 %v1731_v1  ;;  %675 = vmatprep.mubr.f32.mxu1 %v1731_v1  ;;  %s1659_s15 = scalar_lea.vmem %s1658_s6, 256  ;;  %p1660_p1 = scmp.lt.s32.totalorder %s1381_s23, %s1658_s6 }
  0x16   : > { %v1815_v2 = vshrl.u32 %v2371_v0, 7  ;;  %s1485_s27 = sshll.u32 %s1812_s26, 1  ;;  %s1592_s4 = sshll.u32 %s1812_s26, 8 }
  0x17   : > { %s221_s30 = scalar_lea.vmem %s2368_s1, %s1485_s27  ;;  %s1829_s7 = scalar_lea.vmem %s2367_s0, %s1592_s4 }
  0x18   : > { %v307_v3 = vsub.s32 1, %v1815_v2  ;;  %v303_v4 = vsub.s32 0, %v1815_v2  ;;  %v294_v5 = vld [vmem:[%s221_s30] sm:$0x3]  ;;  %v380_v16 = vld [vmem:[%s1829_s7 + $0x8] sm:$0xff]  ;;  %v381_v18 = vld [vmem:[%s1829_s7 + $0x10] sm:$0xff]  ;;  %s225_s10 = scalar_lea.vmem %s2369_s2, %s1485_s27 }
  0x19   : > { %v295_v6 = vshra.s32 %v294_v5, 8  ;;  %v903_v7 = vand.u32 255, %v294_v5  ;;  %v379_v14 = vld [vmem:[%s1829_s7] sm:$0xff]  ;;  %v396_v17 = vld [vmem:[%s1829_s7 + $0x88] sm:$0xff]  ;;  %v397_v19 = vld [vmem:[%s1829_s7 + $0x90] sm:$0xff]  ;;  %s1367_s30 = scalar_lea.sflag [#allocation4], %s207_s11 }
  0x1a   : > { %v395_v15 = vld [vmem:[%s1829_s7 + $0x80] sm:$0xff]  ;;  %v382_v20 = vld [vmem:[%s1829_s7 + $0x18] sm:$0xff]  ;;  %v384_v24 = vld [vmem:[%s1829_s7 + $0x28] sm:$0xff]  ;;  %s1653_s4 = scalar_lea.vmem %s1381_s23, 128 }
  0x1b   : > { %v308_v8 = vrot.slane %v295_v6, %v307_v3  ;;  %v1831_v9 = vrot.slane %v903_v7, %v307_v3  ;;  %v304_v10 = vrot.slane %v295_v6, %v303_v4  ;;  %v1833_v11 = vrot.slane %v903_v7, %v303_v4  ;;  %v398_v21 = vld [vmem:[%s1829_s7 + $0x98] sm:$0xff]  ;;  %v383_v22 = vld [vmem:[%s1829_s7 + $0x20] sm:$0xff]  ;;  %v400_v25 = vld [vmem:[%s1829_s7 + $0xa8] sm:$0xff]  ;;  %p1654_p12 = scmp.ne.s32.totalorder %s1381_s23, %s1653_s4  ;;  %p1661_p2 = scmp.lt.s32.totalorder %s1659_s15, %s1653_s4 }
  0x1c   : > { %v399_v23 = vld [vmem:[%s1829_s7 + $0xa0] sm:$0xff]  ;;  %v385_v26 = vld [vmem:[%s1829_s7 + $0x30] sm:$0xff]  ;;  %v386_v28 = vld [vmem:[%s1829_s7 + $0x38] sm:$0xff]  ;;  %v904_v3 = vadd.s32 8, %v1815_v2  ;;  %v905_v6 = vadd.s32 16, %v1815_v2 }
  0x1d   : > { %vm310_vm1 = vcmp.eq.s32.totalorder %v1815_v2, %v308_v8  ;;  %vm309_vm2 = vcmp.eq.s32.totalorder %v1815_v2, %v304_v10  ;;  %v401_v27 = vld [vmem:[%s1829_s7 + $0xb0] sm:$0xff]  ;;  %v402_v29 = vld [vmem:[%s1829_s7 + $0xb8] sm:$0xff]  ;;  %v387_v30 = vld [vmem:[%s1829_s7 + $0x40] sm:$0xff]  ;;  %v906_v10 = vadd.s32 24, %v1815_v2  ;;  %vm943_vm4 = vcmp.eq.s32.totalorder %v1815_v2, %v1833_v11  ;;  %p1655_p13 = pnand %p1654_p12, %p1793_p4  ;;  %p1662_p3 = por %p1661_p2, %p1660_p1 }
  0x1e   : > { %v1488_v12 = vsel %vm310_vm1, 1.0, %v1731_v1  ;;  %v1487_v13 = vsel %vm309_vm2, 1.0, %v1731_v1  ;;  %v403_v31 = vld [vmem:[%s1829_s7 + $0xc0] sm:$0xff]  ;;  %v388_v32 = vld [vmem:[%s1829_s7 + $0x48] sm:$0xff]  ;;  %v389_v34 = vld [vmem:[%s1829_s7 + $0x50] sm:$0xff]  ;;  %vm944_vm5 = vcmp.eq.s32.totalorder %v1815_v2, %v1831_v9  ;;  %vm945_vm6 = vcmp.eq.s32.totalorder %v904_v3, %v1833_v11 }
  0x1f   : > { %1489 = vmatprep.subr.msk.mxu0 %vm508_vm0, %v1488_v12  ;;  %1593 = vmatprep.subr.msk.mxu1 %vm508_vm0, %v1488_v12  ;;  %v404_v33 = vld [vmem:[%s1829_s7 + $0xc8] sm:$0xff]  ;;  %v405_v35 = vld [vmem:[%s1829_s7 + $0xd0] sm:$0xff]  ;;  %v390_v36 = vld [vmem:[%s1829_s7 + $0x58] sm:$0xff]  ;;  %vm946_vm7 = vcmp.eq.s32.totalorder %v904_v3, %v1831_v9  ;;  %vm947_vm8 = vcmp.eq.s32.totalorder %v905_v6, %v1833_v11  ;;  %vm948_vm9 = vcmp.eq.s32.totalorder %v905_v6, %v1831_v9  ;;  %p1656_p0 = pneg %p1655_p13 }
  0x20   : > { %1490 = vmatpush1.msk.msra.mxu0 %vm508_vm0, %v1487_v13  ;;  %1594 = vmatpush1.msk.msra.mxu1 %vm508_vm0, %v1487_v13  ;;  %v406_v37 = vld [vmem:[%s1829_s7 + $0xd8] sm:$0xff]  ;;  %v391_v38 = vld [vmem:[%s1829_s7 + $0x60] sm:$0xff]  ;;  %v392_v40 = vld [vmem:[%s1829_s7 + $0x68] sm:$0xff]  ;;  %vm949_vm10 = vcmp.eq.s32.totalorder %v906_v10, %v1833_v11  ;;  %vm950_vm11 = vcmp.eq.s32.totalorder %v906_v10, %v1831_v9 }
  0x21   : > { %1491 = vmatmul.mubr.msk.f32.vlgmr.msra.gmra.mxu0 %vm411_vm3, %v379_v14  ;;  %1507 = vmatmul.mubr.msk.f32.vlgmr.msra.gmra.mxu1 %vm411_vm3, %v395_v15  ;;  %v407_v39 = vld [vmem:[%s1829_s7 + $0xe0] sm:$0xff]  ;;  %v408_v41 = vld [vmem:[%s1829_s7 + $0xe8] sm:$0xff]  ;;  %v393_v42 = vld [vmem:[%s1829_s7 + $0x70] sm:$0xff]  ;;  %v907_v14 = vadd.s32 32, %v1815_v2  ;;  %v908_v15 = vadd.s32 40, %v1815_v2  ;;  %p1663_p5 = pnand %p1662_p3, %p1656_p0 }
  0x22   : > { %585 = vmatprep.mubr.f32.mxu0 %v1731_v1  ;;  %681 = vmatprep.mubr.f32.mxu1 %v1731_v1  ;;  %v409_v43 = vld [vmem:[%s1829_s7 + $0xf0] sm:$0xff]  ;;  %v394_v44 = vld [vmem:[%s1829_s7 + $0x78] sm:$0xff] }
  0x23   : > { %v410_v45 = vld [vmem:[%s1829_s7 + $0xf8] sm:$0xff]  ;;  %vm951_vm12 = vcmp.eq.s32.totalorder %v907_v14, %v1833_v11  ;;  %vm952_vm13 = vcmp.eq.s32.totalorder %v907_v14, %v1831_v9  ;;  %vm953_vm14 = vcmp.eq.s32.totalorder %v908_v15, %v1833_v11  ;;  %vm954_vm15 = vcmp.eq.s32.totalorder %v908_v15, %v1831_v9 }
  0x25   : > { %1492 = vmatmul.mubr.msk.f32.gmra.mxu0 %vm411_vm3, %v380_v16  ;;  %1508 = vmatmul.mubr.msk.f32.gmra.mxu1 %vm411_vm3, %v396_v17  ;;  %v909_v17 = vadd.s32 48, %v1815_v2 }
  0x26   : > { %591 = vmatprep.mubr.f32.mxu0 %v1731_v1  ;;  %687 = vmatprep.mubr.f32.mxu1 %v1731_v1 }
  0x27   : > { %vm955_vm0 = vcmp.eq.s32.totalorder %v909_v17, %v1833_v11  ;;  %vm956_vm1 = vcmp.eq.s32.totalorder %v909_v17, %v1831_v9 }
  0x29   : > { %1493 = vmatmul.mubr.msk.f32.gmra.mxu0 %vm411_vm3, %v381_v18  ;;  %1509 = vmatmul.mubr.msk.f32.gmra.mxu1 %vm411_vm3, %v397_v19  ;;  %v1523_v19 = vsel %vm943_vm4, 1.0, %v1731_v1 }
  0x2a   : > { %597 = vmatprep.mubr.f32.mxu0 %v1731_v1  ;;  %693 = vmatprep.mubr.f32.mxu1 %v1731_v1 }
  0x2d   : > { %1494 = vmatmul.mubr.msk.f32.gmra.mxu0 %vm411_vm3, %v382_v20  ;;  %1510 = vmatmul.mubr.msk.f32.gmra.mxu1 %vm411_vm3, %v398_v21  ;;  %v1524_v20 = vsel %vm944_vm5, 1.0, %v1731_v1  ;;  %v910_v21 = vadd.s32 56, %v1815_v2 }
  0x2e   : > { %603 = vmatprep.mubr.f32.mxu0 %v1731_v1  ;;  %699 = vmatprep.mubr.f32.mxu1 %v1731_v1 }
  0x2f   : > { %vm957_vm2 = vcmp.eq.s32.totalorder %v910_v21, %v1833_v11 }
  0x31   : > { %1495 = vmatmul.mubr.msk.f32.gmra.mxu0 %vm411_vm3, %v383_v22  ;;  %1511 = vmatmul.mubr.msk.f32.gmra.mxu1 %vm411_vm3, %v399_v23  ;;  %v1525_v22 = vsel %vm945_vm6, 1.0, %v1731_v1  ;;  %v1526_v23 = vsel %vm946_vm7, 1.0, %v1731_v1 }
  0x32   : > { %609 = vmatprep.mubr.f32.mxu0 %v1731_v1  ;;  %705 = vmatprep.mubr.f32.mxu1 %v1731_v1 }
  0x35   : > { %1496 = vmatmul.mubr.msk.f32.gmra.mxu0 %vm411_vm3, %v384_v24  ;;  %1512 = vmatmul.mubr.msk.f32.gmra.mxu1 %vm411_vm3, %v400_v25  ;;  %v1527_v24 = vsel %vm947_vm8, 1.0, %v1731_v1 }
  0x36   : > { %615 = vmatprep.mubr.f32.mxu0 %v1731_v1  ;;  %711 = vmatprep.mubr.f32.mxu1 %v1731_v1 }
  0x39   : > { %1497 = vmatmul.mubr.msk.f32.gmra.mxu0 %vm411_vm3, %v385_v26  ;;  %1513 = vmatmul.mubr.msk.f32.gmra.mxu1 %vm411_vm3, %v401_v27  ;;  %v1528_v27 = vsel %vm948_vm9, 1.0, %v1731_v1 }
  0x3a   : > { %621 = vmatprep.mubr.f32.mxu0 %v1731_v1  ;;  %717 = vmatprep.mubr.f32.mxu1 %v1731_v1 }
  0x3d   : > { %1498 = vmatmul.mubr.msk.f32.gmra.mxu0 %vm411_vm3, %v386_v28  ;;  %1514 = vmatmul.mubr.msk.f32.gmra.mxu1 %vm411_vm3, %v402_v29  ;;  %v1529_v28 = vsel %vm949_vm10, 1.0, %v1731_v1 }
  0x3e   : > { %627 = vmatprep.mubr.f32.mxu0 %v1731_v1  ;;  %723 = vmatprep.mubr.f32.mxu1 %v1731_v1 }
  0x41   : > { %1499 = vmatmul.mubr.msk.f32.gmra.mxu0 %vm411_vm3, %v387_v30  ;;  %1515 = vmatmul.mubr.msk.f32.gmra.mxu1 %vm411_vm3, %v403_v31  ;;  %v919_v30 = vadd.s32 128, %v1815_v2 }
  0x42   : > { %633 = vmatprep.mubr.f32.mxu0 %v1731_v1  ;;  %729 = vmatprep.mubr.f32.mxu1 %v1731_v1 }
  0x43   : > { %vm975_vm4 = vcmp.eq.s32.totalorder %v919_v30, %v1833_v11  ;;  %vm976_vm6 = vcmp.eq.s32.totalorder %v919_v30, %v1831_v9 }
  0x45   : > { %1500 = vmatmul.mubr.msk.f32.gmra.mxu0 %vm411_vm3, %v388_v32  ;;  %1516 = vmatmul.mubr.msk.f32.gmra.mxu1 %vm411_vm3, %v404_v33  ;;  %v1530_v32 = vsel %vm950_vm11, 1.0, %v1731_v1  ;;  %v911_v33 = vadd.s32 64, %v1815_v2 }
  0x46   : > { %639 = vmatprep.mubr.f32.mxu0 %v1731_v1  ;;  %735 = vmatprep.mubr.f32.mxu1 %v1731_v1 }
  0x47   : > { %vm959_vm5 = vcmp.eq.s32.totalorder %v911_v33, %v1833_v11  ;;  %vm960_vm7 = vcmp.eq.s32.totalorder %v911_v33, %v1831_v9 }
  0x49   : > { %1501 = vmatmul.mubr.msk.f32.gmra.mxu0 %vm411_vm3, %v389_v34  ;;  %1517 = vmatmul.mubr.msk.f32.gmra.mxu1 %vm411_vm3, %v405_v35  ;;  %v1531_v34 = vsel %vm951_vm12, 1.0, %v1731_v1  ;;  %v1532_v35 = vsel %vm952_vm13, 1.0, %v1731_v1 }
  0x4a   : > { %645 = vmatprep.mubr.f32.mxu0 %v1731_v1  ;;  %741 = vmatprep.mubr.f32.mxu1 %v1731_v1 }
  0x4d   : > { %1502 = vmatmul.mubr.msk.f32.gmra.mxu0 %vm411_vm3, %v390_v36  ;;  %1518 = vmatmul.mubr.msk.f32.gmra.mxu1 %vm411_vm3, %v406_v37  ;;  %v1533_v36 = vsel %vm953_vm14, 1.0, %v1731_v1 }
  0x4e   : > { %651 = vmatprep.mubr.f32.mxu0 %v1731_v1  ;;  %747 = vmatprep.mubr.f32.mxu1 %v1731_v1 }
  0x51   : > { %1503 = vmatmul.mubr.msk.f32.gmra.mxu0 %vm411_vm3, %v391_v38  ;;  %1519 = vmatmul.mubr.msk.f32.gmra.mxu1 %vm411_vm3, %v407_v39  ;;  %v920_v38 = vadd.s32 136, %v1815_v2 }
  0x52   : > { %657 = vmatprep.mubr.f32.mxu0 %v1731_v1  ;;  %753 = vmatprep.mubr.f32.mxu1 %v1731_v1 }
  0x53   : > { %vm977_vm8 = vcmp.eq.s32.totalorder %v920_v38, %v1833_v11  ;;  %vm978_vm10 = vcmp.eq.s32.totalorder %v920_v38, %v1831_v9 }
  0x54   : > { %v2096_v33 = vsel %vm978_vm10, 1.0, %v1731_v1 }
  0x55   : > { %1504 = vmatmul.mubr.msk.f32.gmra.mxu0 %vm411_vm3, %v392_v40  ;;  %1520 = vmatmul.mubr.msk.f32.gmra.mxu1 %vm411_vm3, %v408_v41  ;;  %v1534_v41 = vsel %vm954_vm15, 1.0, %v1731_v1 }
  0x56   : > { %663 = vmatprep.mubr.f32.mxu0 %v1731_v1  ;;  %759 = vmatprep.mubr.f32.mxu1 %v1731_v1 }
  0x59   : > { %1505 = vmatmul.mubr.msk.f32.gmra.mxu0 %vm411_vm3, %v393_v42  ;;  %1521 = vmatmul.mubr.msk.f32.gmra.mxu1 %vm411_vm3, %v409_v43  ;;  %v1535_v42 = vsel %vm955_vm0, 1.0, %v1731_v1  ;;  %v1536_v43 = vsel %vm956_vm1, 1.0, %v1731_v1 }
  0x5a   : > { %669 = vmatprep.mubr.f32.mxu0 %v1731_v1  ;;  %765 = vmatprep.mubr.f32.mxu1 %v1731_v1 }
  0x5d   : > { %1506 = vmatmul.mubr.msk.f32.gmra.mxu0 %vm411_vm3, %v394_v44  ;;  %1522 = vmatmul.mubr.msk.f32.gmra.mxu1 %vm411_vm3, %v410_v45  ;;  %vm958_vm3 = vcmp.eq.s32.totalorder %v910_v21, %v1831_v9  ;;  %v1537_v44 = vsel %vm957_vm2, 1.0, %v1731_v1 }
  0x5e   : > { %v1538_v15 = vsel %vm958_vm3, 1.0, %v1731_v1 }
  0xe1   : > { %v1933_v46 = vpop.f32.mrf.mxu0  ;;  %v1935_v47 = vpop.f32.mrf.mxu1 }
  0xe2   : > { %v1199_v6 = vmul.f32 %v1523_v19, %v1933_v46  ;;  %v1539_v19 = vsel %vm959_vm5, 1.0, %v1731_v1 }
  0xe3   : > { %v1937_v48 = vpop.f32.mrf.mxu0  ;;  %v1939_v49 = vpop.f32.mrf.mxu1 }
  0xe4   : > { %v1200_v21 = vmul.f32 %v1524_v20, %v1937_v48 }
  0xe5   : > { %v1941_v50 = vpop.f32.mrf.mxu0  ;;  %v1943_v51 = vpop.f32.mrf.mxu1 }
  0xe6   : > { %v1201_v40 = vmul.f32 %v1525_v22, %v1941_v50  ;;  %v912_v50 = vadd.s32 72, %v1815_v2 }
  0xe7   : > { %v1945_v52 = vpop.f32.mrf.mxu0  ;;  %v1947_v53 = vpop.f32.mrf.mxu1 }
  0xe8   : > { %v1202_v10 = vmul.f32 %v1526_v23, %v1945_v52  ;;  %v1263_v22 = vadd.f32 %v1201_v40, %v1199_v6  ;;  %vm961_vm9 = vcmp.eq.s32.totalorder %v912_v50, %v1833_v11  ;;  %v2085_v40 = vsel %vm977_vm8, 1.0, %v1731_v1 }
  0xe9   : > { %v1949_v54 = vpop.f32.mrf.mxu0  ;;  %v1951_v55 = vpop.f32.mrf.mxu1  ;;  %vm962_vm11 = vcmp.eq.s32.totalorder %v912_v50, %v1831_v9  ;;  %v917_v50 = vadd.s32 112, %v1815_v2 }
  0xea   : > { %v1203_v14 = vmul.f32 %v1527_v24, %v1949_v54  ;;  %v2065_v54 = vsel %vm975_vm4, 1.0, %v1731_v1  ;;  %v1300_v48 = vadd.f32 %v1202_v10, %v1200_v21  ;;  %v913_v10 = vadd.s32 80, %v1815_v2 }
  0xeb   : > { %v1953_v56 = vpop.f32.mrf.mxu0  ;;  %v1955_v57 = vpop.f32.mrf.mxu1  ;;  %v914_v21 = vadd.s32 88, %v1815_v2  ;;  %vm971_vm4 = vcmp.eq.s32.totalorder %v917_v50, %v1833_v11 }
  0xec   : > { %v1204_v46 = vmul.f32 %v1528_v27, %v1953_v56  ;;  %v1264_v20 = vadd.f32 %v1263_v22, %v1203_v14  ;;  %v2077_v27 = vsel %vm976_vm6, 1.0, %v1731_v1  ;;  %vm963_vm12 = vcmp.eq.s32.totalorder %v913_v10, %v1833_v11 }
  0xed   : > { %v1957_v58 = vpop.f32.mrf.mxu0  ;;  %v1959_v59 = vpop.f32.mrf.mxu1  ;;  %vm964_vm13 = vcmp.eq.s32.totalorder %v913_v10, %v1831_v9  ;;  %vm965_vm14 = vcmp.eq.s32.totalorder %v914_v21, %v1833_v11  ;;  %vm966_vm15 = vcmp.eq.s32.totalorder %v914_v21, %v1831_v9  ;;  %vm972_vm6 = vcmp.eq.s32.totalorder %v917_v50, %v1831_v9 }
  0xee   : > { %v1205_v52 = vmul.f32 %v1529_v28, %v1957_v58  ;;  %v1540_v28 = vsel %vm960_vm7, 1.0, %v1731_v1 }
  0xef   : > { %v1961_v60 = vpop.f32.mrf.mxu0  ;;  %v1963_v61 = vpop.f32.mrf.mxu1 }
  0xf0   : > { %v1206_v56 = vmul.f32 %v1530_v32, %v1961_v60  ;;  %v1301_v60 = vadd.f32 %v1300_v48, %v1204_v46  ;;  %v1265_v32 = vadd.f32 %v1264_v20, %v1205_v52  ;;  %v915_v52 = vadd.s32 96, %v1815_v2 }
  0xf1   : > { %v1965_v62 = vpop.f32.mrf.mxu0  ;;  %v1967_v63 = vpop.f32.mrf.mxu1 }
  0xf2   : > { %v1207_v58 = vmul.f32 %v1531_v34, %v1965_v62  ;;  %v1541_v34 = vsel %vm961_vm9, 1.0, %v1731_v1  ;;  %v1302_v46 = vadd.f32 %v1301_v60, %v1206_v56  ;;  %vm967_vm0 = vcmp.eq.s32.totalorder %v915_v52, %v1833_v11 }
  0xf3   : > { %v1970_v4 = vpop.f32.mrf.mxu0  ;;  %v1972_v5 = vpop.f32.mrf.mxu1  ;;  %vm968_vm1 = vcmp.eq.s32.totalorder %v915_v52, %v1831_v9 }
  0xf4   : > { %v1208_v62 = vmul.f32 %v1532_v35, %v1970_v4  ;;  %v1266_v4 = vadd.f32 %v1265_v32, %v1207_v58 }
  0xf5   : > { %v1975_v7 = vpop.f32.mrf.mxu0  ;;  %v1977_v8 = vpop.f32.mrf.mxu1 }
  0xf6   : > { %v1209_v30 = vmul.f32 %v1533_v36, %v1975_v7  ;;  %v2105_v36 = vadd.s32 144, %v1815_v2  ;;  %v1303_v48 = vadd.f32 %v1302_v46, %v1208_v62 }
  0xf7   : > { %v1985_v12 = vpop.f32.mrf.mxu0  ;;  %v1987_v13 = vpop.f32.mrf.mxu1 }
  0xf8   : > { %v1210_v7 = vmul.f32 %v1534_v41, %v1985_v12  ;;  %v1267_v20 = vadd.f32 %v1266_v4, %v1209_v30  ;;  %v1542_v12 = vsel %vm962_vm11, 1.0, %v1731_v1  ;;  %v916_v41 = vadd.s32 104, %v1815_v2 }
  0xf9   : > { %v1994_v16 = vpop.f32.mrf.mxu0  ;;  %v1997_v18 = vpop.f32.mrf.mxu1  ;;  %vm979_vm5 = vcmp.eq.s32.totalorder %v2105_v36, %v1833_v11  ;;  %vm980_vm8 = vcmp.eq.s32.totalorder %v2105_v36, %v1831_v9 }
  0xfa   : > { %v1211_v35 = vmul.f32 %v1535_v42, %v1994_v16  ;;  %v1304_v58 = vadd.f32 %v1303_v48, %v1210_v7  ;;  %vm969_vm2 = vcmp.eq.s32.totalorder %v916_v41, %v1833_v11  ;;  %vm970_vm3 = vcmp.eq.s32.totalorder %v916_v41, %v1831_v9 }
  0xfb   : > { %v2007_v25 = vpop.f32.mrf.mxu0  ;;  %v2009_v26 = vpop.f32.mrf.mxu1  ;;  %v1550_v52 = vsel %vm970_vm3, 1.0, %v1731_v1  ;;  %v1552_v41 = vsel %vm972_vm6, 1.0, %v1731_v1 }
  0xfc   : > { %v1212_v0 = vmul.f32 %v1536_v43, %v2007_v25  ;;  %v1268_v60 = vadd.f32 %v1267_v20, %v1211_v35  ;;  %v1544_v43 = vsel %vm964_vm13, 1.0, %v1731_v1 }
  0xfd   : > { %v2018_v29 = vpop.f32.mrf.mxu0  ;;  %v2021_v31 = vpop.f32.mrf.mxu1 }
  0xfe   : > { %v1213_v56 = vmul.f32 %v1537_v44, %v2018_v29  ;;  %v1543_v29 = vsel %vm963_vm12, 1.0, %v1731_v1  ;;  %v1305_v62 = vadd.f32 %v1304_v58, %v1212_v0 }
  0xff   : > { %v2030_v37 = vpop.f32.mrf.mxu0  ;;  %v2033_v39 = vpop.f32.mrf.mxu1 }
 0x100   : > { %v1214_v32 = vmul.f32 %v1538_v15, %v2030_v37  ;;  %v1269_v30 = vadd.f32 %v1268_v60, %v1213_v56  ;;  %v1545_v37 = vsel %vm965_vm14, 1.0, %v1731_v1  ;;  %v1549_v56 = vsel %vm969_vm2, 1.0, %v1731_v1 }
 0x101   : > { %v2046_v45 = vpop.f32.mrf.mxu0  ;;  %v2049_v3 = vpop.f32.mrf.mxu1 }
 0x102   : > { %v1215_v25 = vmul.f32 %v1539_v19, %v2046_v45  ;;  %v1546_v45 = vsel %vm966_vm15, 1.0, %v1731_v1  ;;  %v1306_v10 = vadd.f32 %v1305_v62, %v1214_v32  ;;  %v922_v32 = vadd.s32 152, %v1815_v2 }
 0x103   : > { %v631_v17 = vpop.f32.mrf.mxu0  ;;  %v2070_v24 = vpop.f32.mrf.mxu1 }
 0x104   : > { %v1216_v46 = vmul.f32 %v1540_v28, %v631_v17  ;;  %v1270_v0 = vadd.f32 %v1269_v30, %v1215_v25  ;;  %vm981_vm10 = vcmp.eq.s32.totalorder %v922_v32, %v1833_v11  ;;  %vm982_vm11 = vcmp.eq.s32.totalorder %v922_v32, %v1831_v9 }
 0x105   : > { %v635_v23 = vpop.f32.mrf.mxu0  ;;  %v2100_v22 = vpop.f32.mrf.mxu1  ;;  %v1561_v36 = vsel %vm981_vm10, 1.0, %v1731_v1 }
 0x106   : > { %v1217_v4 = vmul.f32 %v1541_v34, %v635_v23  ;;  %v1547_v23 = vsel %vm967_vm0, 1.0, %v1731_v1  ;;  %v918_v34 = vadd.s32 120, %v1815_v2  ;;  %v1307_v21 = vadd.f32 %v1306_v10, %v1216_v46 }
 0x107   : > { %v637_v6 = vpop.f32.mrf.mxu0  ;;  %v2118_v42 = vpop.f32.mrf.mxu1 }
 0x108   : > { %v1218_v7 = vmul.f32 %v1542_v12, %v637_v6  ;;  %v1271_v35 = vadd.f32 %v1270_v0, %v1217_v4  ;;  %v1548_v6 = vsel %vm968_vm1, 1.0, %v1731_v1  ;;  %vm973_vm7 = vcmp.eq.s32.totalorder %v918_v34, %v1833_v11 }
 0x109   : > { %v641_v14 = vpop.f32.mrf.mxu0  ;;  %v2138_v19 = vpop.f32.mrf.mxu1  ;;  %vm974_vm9 = vcmp.eq.s32.totalorder %v918_v34, %v1831_v9  ;;  %v1553_v50 = vsel %vm973_vm7, 1.0, %v1731_v1  ;;  %v1231_v34 = vmul.f32 %v2065_v54, %v1935_v47  ;;  %v1233_v47 = vmul.f32 %v2085_v40, %v1943_v51 }
 0x10a   : > { %v1219_v17 = vmul.f32 %v1543_v29, %v641_v14  ;;  %v1308_v58 = vadd.f32 %v1307_v21, %v1218_v7  ;;  %v1551_v29 = vsel %vm971_vm4, 1.0, %v1731_v1  ;;  %v1559_v7 = vsel %vm979_vm5, 1.0, %v1731_v1 }
 0x10b   : > { %v643_v38 = vpop.f32.mrf.mxu0  ;;  %v2155_v12 = vpop.f32.mrf.mxu1 }
 0x10c   : > { %v1220_v48 = vmul.f32 %v1544_v43, %v643_v38  ;;  %v1272_v60 = vadd.f32 %v1271_v35, %v1219_v17  ;;  %v924_v17 = vadd.s32 168, %v1815_v2 }
 0x10d   : > { %v647_v16 = vpop.f32.mrf.mxu0 }
 0x10e   : > { %v1221_v20 = vmul.f32 %v1545_v37, %v647_v16  ;;  %v1309_v43 = vadd.f32 %v1308_v58, %v1220_v48  ;;  %v2172_v37 = vpop.f32.mrf.mxu1  ;;  %v1560_v48 = vsel %vm980_vm8, 1.0, %v1731_v1  ;;  %vm985_vm14 = vcmp.eq.s32.totalorder %v924_v17, %v1833_v11 }
 0x10f   : > { %v649_v44 = vpop.f32.mrf.mxu0  ;;  %vm986_vm15 = vcmp.eq.s32.totalorder %v924_v17, %v1831_v9 }
 0x110   : > { %v1222_v38 = vmul.f32 %v1546_v45, %v649_v44  ;;  %v1273_v62 = vadd.f32 %v1272_v60, %v1221_v20  ;;  %v923_v44 = vadd.s32 160, %v1815_v2  ;;  %v925_v20 = vadd.s32 176, %v1815_v2 }
 0x111   : > { %v653_v15 = vpop.f32.mrf.mxu0  ;;  %v1566_v51 = vsel %vm986_vm15, 1.0, %v1731_v1 }
 0x112   : > { %v1223_v16 = vmul.f32 %v1547_v23, %v653_v15  ;;  %v1310_v45 = vadd.f32 %v1309_v43, %v1222_v38  ;;  %vm983_vm12 = vcmp.eq.s32.totalorder %v923_v44, %v1833_v11  ;;  %vm984_vm13 = vcmp.eq.s32.totalorder %v923_v44, %v1831_v9 }
 0x113   : > { %v655_v28 = vpop.f32.mrf.mxu0  ;;  %v1564_v32 = vsel %vm984_vm13, 1.0, %v1731_v1  ;;  %vm987_vm0 = vcmp.eq.s32.totalorder %v925_v20, %v1833_v11  ;;  %v1565_v44 = vsel %vm985_vm14, 1.0, %v1731_v1  ;;  %vm988_vm1 = vcmp.eq.s32.totalorder %v925_v20, %v1831_v9 }
 0x114   : > { %v1224_v30 = vmul.f32 %v1548_v6, %v655_v28  ;;  %v1274_v15 = vadd.f32 %v1273_v62, %v1223_v16  ;;  %v1562_v16 = vsel %vm982_vm11, 1.0, %v1731_v1  ;;  %v1567_v40 = vsel %vm987_vm0, 1.0, %v1731_v1 }
 0x115   : > { %v659_v14 = vpop.f32.mrf.mxu0 }
 0x116   : > { %v1225_v46 = vmul.f32 %v1549_v56, %v659_v14  ;;  %v1311_v28 = vadd.f32 %v1310_v45, %v1224_v30  ;;  %v1554_v14 = vsel %vm974_vm9, 1.0, %v1731_v1  ;;  %v2193_v56 = vpop.f32.mrf.mxu1  ;;  %v1563_v30 = vsel %vm983_vm12, 1.0, %v1731_v1 }
 0x117   : > { %v661_v25 = vpop.f32.mrf.mxu0  ;;  %v927_v45 = vadd.s32 192, %v1815_v2 }
 0x118   : > { %v1226_v10 = vmul.f32 %v1550_v52, %v661_v25  ;;  %v1275_v21 = vadd.f32 %v1274_v15, %v1225_v46  ;;  %v926_v25 = vadd.s32 184, %v1815_v2  ;;  %v2210_v46 = vpop.f32.mrf.mxu1  ;;  %v1234_v15 = vmul.f32 %v2096_v33, %v1947_v53 }
 0x119   : > { %v665_v4 = vpop.f32.mrf.mxu0  ;;  %vm991_vm4 = vcmp.eq.s32.totalorder %v927_v45, %v1833_v11  ;;  %vm992_vm5 = vcmp.eq.s32.totalorder %v927_v45, %v1831_v9  ;;  %v934_v45 = vadd.s32 248, %v1815_v2 }
 0x11a   : > { %v1227_v0 = vmul.f32 %v1551_v29, %v665_v4  ;;  %v1312_v58 = vadd.f32 %v1311_v28, %v1226_v10  ;;  %v1232_v4 = vmul.f32 %v2077_v27, %v1939_v49  ;;  %vm989_vm2 = vcmp.eq.s32.totalorder %v926_v25, %v1833_v11  ;;  %v2229_v17 = vpop.f32.mrf.mxu1 }
 0x11b   : > { %v667_v23 = vpop.f32.mrf.mxu0  ;;  %v1235_v49 = vmul.f32 %v1559_v7, %v1951_v55  ;;  %vm990_vm3 = vcmp.eq.s32.totalorder %v926_v25, %v1831_v9  ;;  %v1568_v55 = vsel %vm988_vm1, 1.0, %v1731_v1  ;;  %v1569_v33 = vsel %vm989_vm2, 1.0, %v1731_v1 }
 0x11c   : > { %v1228_v35 = vmul.f32 %v1552_v41, %v667_v23  ;;  %v1276_v60 = vadd.f32 %v1275_v21, %v1227_v0  ;;  %v928_v0 = vadd.s32 200, %v1815_v2  ;;  %v1236_v23 = vmul.f32 %v1560_v48, %v1955_v57  ;;  %v2247_v20 = vpop.f32.mrf.mxu1 }
 0x11d   : > { %v671_v6 = vpop.f32.mrf.mxu0  ;;  %v929_v7 = vadd.s32 208, %v1815_v2  ;;  %v1238_v21 = vmul.f32 %v1562_v16, %v1963_v61  ;;  %v1239_v57 = vmul.f32 %v1563_v30, %v1967_v63  ;;  %v1570_v48 = vsel %vm990_vm3, 1.0, %v1731_v1 }
 0x11e   : > { %v1229_v38 = vmul.f32 %v1553_v50, %v671_v6  ;;  %v1313_v29 = vadd.f32 %v1312_v58, %v1228_v35  ;;  %v1237_v50 = vmul.f32 %v1561_v36, %v1959_v59  ;;  %vm993_vm6 = vcmp.eq.s32.totalorder %v928_v0, %v1833_v11 }
 0x11f   : > { %v673_v52 = vpop.f32.mrf.mxu0  ;;  %vm994_vm7 = vcmp.eq.s32.totalorder %v928_v0, %v1831_v9  ;;  %v1240_v6 = vmul.f32 %v1564_v32, %v1972_v5  ;;  %v1571_v63 = vsel %vm991_vm4, 1.0, %v1731_v1  ;;  %vm995_vm8 = vcmp.eq.s32.totalorder %v929_v7, %v1833_v11 }
 0x120   : > { %v1277_v43 = vadd.f32 %v1276_v60, %v1229_v38  ;;  %v1230_v62 = vmul.f32 %v1554_v14, %v673_v52  ;;  %v1241_v14 = vmul.f32 %v1565_v44, %v1977_v8  ;;  %vm996_vm9 = vcmp.eq.s32.totalorder %v929_v7, %v1831_v9 }
 0x121   : > { %v930_v60 = vadd.s32 216, %v1815_v2  ;;  %v1242_v38 = vmul.f32 %v1566_v51, %v1987_v13  ;;  %v1243_v36 = vmul.f32 %v1567_v40, %v1997_v18  ;;  %v1572_v5 = vsel %vm992_vm5, 1.0, %v1731_v1 }
 0x122   : > { %v1278_v54 = vadd.f32 %v1277_v43, %v1231_v34  ;;  %v1314_v41 = vadd.f32 %v1313_v29, %v1230_v62  ;;  %v1573_v8 = vsel %vm993_vm6, 1.0, %v1731_v1  ;;  %v1574_v52 = vsel %vm994_vm7, 1.0, %v1731_v1  ;;  %v757_v29 = vpop.f32.mrf.mxu1 }
 0x123   : > { %v931_v34 = vadd.s32 224, %v1815_v2  ;;  %v1244_v13 = vmul.f32 %v1568_v55, %v2009_v26  ;;  %v1245_v18 = vmul.f32 %v1569_v33, %v2021_v31  ;;  %v1575_v30 = vsel %vm995_vm8, 1.0, %v1731_v1 }
 0x124   : > { %v1279_v27 = vadd.f32 %v1278_v54, %v1233_v47  ;;  %v1315_v10 = vadd.f32 %v1314_v41, %v1232_v4  ;;  %v1576_v32 = vsel %vm996_vm9, 1.0, %v1731_v1  ;;  %vm997_vm10 = vcmp.eq.s32.totalorder %v930_v60, %v1833_v11  ;;  %v761_v41 = vpop.f32.mrf.mxu1 }
 0x125   : > { %v932_v4 = vadd.s32 232, %v1815_v2  ;;  %v1246_v47 = vmul.f32 %v1570_v48, %v2033_v39  ;;  %v1247_v26 = vmul.f32 %v1571_v63, %v2049_v3  ;;  %vm998_vm11 = vcmp.eq.s32.totalorder %v930_v60, %v1831_v9 }
 0x126   : > { %v1280_v28 = vadd.f32 %v1279_v27, %v1235_v49  ;;  %v1316_v53 = vadd.f32 %v1315_v10, %v1234_v15  ;;  %vm999_vm12 = vcmp.eq.s32.totalorder %v931_v34, %v1833_v11  ;;  %v933_v44 = vadd.s32 240, %v1815_v2 }
 0x127   : > { %v1248_v49 = vmul.f32 %v1572_v5, %v2070_v24  ;;  %v1249_v10 = vmul.f32 %v1573_v8, %v2100_v22  ;;  %v1577_v39 = vsel %vm997_vm10, 1.0, %v1731_v1  ;;  %vm1000_vm13 = vcmp.eq.s32.totalorder %v931_v34, %v1831_v9 }
 0x128   : > { %v1281_v35 = vadd.f32 %v1280_v28, %v1237_v50  ;;  %v1317_v59 = vadd.f32 %v1316_v53, %v1236_v23  ;;  %vm1001_vm14 = vcmp.eq.s32.totalorder %v932_v4, %v1833_v11  ;;  %vm1002_vm15 = vcmp.eq.s32.totalorder %v932_v4, %v1831_v9  ;;  %v763_v23 = vpop.f32.mrf.mxu1 }
 0x129   : > { %v1250_v40 = vmul.f32 %v1574_v52, %v2118_v42  ;;  %v1251_v0 = vmul.f32 %v1575_v30, %v2138_v19  ;;  %v1578_v24 = vsel %vm998_vm11, 1.0, %v1731_v1  ;;  %v1579_v22 = vsel %vm999_vm12, 1.0, %v1731_v1 }
 0x12a   : > { %v1318_v58 = vadd.f32 %v1317_v59, %v1238_v21  ;;  %v1282_v61 = vadd.f32 %v1281_v35, %v1239_v57  ;;  %vm1003_vm0 = vcmp.eq.s32.totalorder %v933_v44, %v1833_v11  ;;  %vm1005_vm1 = vcmp.eq.s32.totalorder %v934_v45, %v1833_v11  ;;  %v767_v35 = vpop.f32.mrf.mxu1 }
 0x12b   : > { %v1252_v53 = vmul.f32 %v1576_v32, %v2155_v12  ;;  %v1253_v42 = vmul.f32 %v1577_v39, %v2172_v37  ;;  %v1580_v19 = vsel %vm1000_vm13, 1.0, %v1731_v1  ;;  %v1581_v55 = vsel %vm1001_vm14, 1.0, %v1731_v1 }
 0x12c   : > { %v1283_v16 = vadd.f32 %v1282_v61, %v1241_v14  ;;  %v1319_v25 = vadd.f32 %v1318_v58, %v1240_v6  ;;  %v1582_v33 = vsel %vm1002_vm15, 1.0, %v1731_v1  ;;  %vm1004_vm2 = vcmp.eq.s32.totalorder %v933_v44, %v1831_v9 }
 0x12d   : > { %v1254_v12 = vmul.f32 %v1578_v24, %v2193_v56  ;;  %v1255_v37 = vmul.f32 %v1579_v22, %v2210_v46  ;;  %v1583_v57 = vsel %vm1003_vm0, 1.0, %v1731_v1  ;;  %v1585_v59 = vsel %vm1005_vm1, 1.0, %v1731_v1 }
 0x12e   : > { %v1284_v43 = vadd.f32 %v1283_v16, %v1243_v36  ;;  %v1320_v62 = vadd.f32 %v1319_v25, %v1242_v38  ;;  %vm1006_vm3 = vcmp.eq.s32.totalorder %v934_v45, %v1831_v9  ;;  %v1256_v6 = vmul.f32 %v1580_v19, %v2229_v17  ;;  %v769_v38 = vpop.f32.mrf.mxu1 }
 0x12f   : > { %v1257_v14 = vmul.f32 %v1581_v55, %v2247_v20  ;;  %v1258_v58 = vmul.f32 %v1582_v33, %v757_v29  ;;  %v1584_v61 = vsel %vm1004_vm2, 1.0, %v1731_v1  ;;  %v1259_v60 = vmul.f32 %v1583_v57, %v761_v41 }
 0x130   : > { %v1285_v54 = vadd.f32 %v1284_v43, %v1245_v18  ;;  %v1321_v31 = vadd.f32 %v1320_v62, %v1244_v13  ;;  %v1261_v46 = vmul.f32 %v1585_v59, %v767_v35  ;;  %v1586_v36 = vsel %vm1006_vm3, 1.0, %v1731_v1 }
 0x131   : > { %v1260_v9 = vmul.f32 %v1584_v61, %v763_v23  ;;  %v1262_v52 = vmul.f32 %v1586_v36, %v769_v38  ;;  %vm1345_vm4 = vcmask 1040384   ;;  %v2374_v24 = vlaneseq }
 0x132   : > { %v1286_v15 = vadd.f32 %v1285_v54, %v1247_v26  ;;  %v1322_v27 = vadd.f32 %v1321_v31, %v1246_v47  ;;  %v1339_v47 = vld [vmem:[%s225_s10] sm:$0x3]  ;;  %vm1356_vm5 = vcmp.eq.s32.totalorder %v1815_v2, 0 }
 0x133   : > { %v1341_v41 = vrot.slane %v1339_v47, 1  ;;  %v1358_v22 = vand.u32 127, %v2374_v24 }
 0x134   : > { %v1323_v3 = vadd.f32 %v1322_v27, %v1248_v49  ;;  %v1287_v51 = vadd.f32 %v1286_v15, %v1249_v10 }
 0x135   : > { %vm1359_vm6 = vcmp.eq.s32.totalorder %v1358_v22, 0 }
 0x136   : > { %v1324_v50 = vadd.f32 %v1323_v3, %v1250_v40  ;;  %v1288_v28 = vadd.f32 %v1287_v51, %v1251_v0  ;;  %vm1360_vm7 = vmand %vm1356_vm5, %vm1359_vm6 }
 0x137   : > { %v1587_v23 = vsel %vm1360_vm7, 1.0, %v1731_v1 }
 0x138   : > { %v1325_v7 = vadd.f32 %v1324_v50, %v1252_v53  ;;  %v1289_v21 = vadd.f32 %v1288_v28, %v1253_v42 }
 0x13a   : > { %v1326_v11 = vadd.f32 %v1325_v7, %v1254_v12  ;;  %v1290_v48 = vadd.f32 %v1289_v21, %v1255_v37 }
 0x13c   : > { %v1327_v63 = vadd.f32 %v1326_v11, %v1256_v6  ;;  %v1291_v56 = vadd.f32 %v1290_v48, %v1257_v14 }
 0x13e   : > { %v1328_v16 = vadd.f32 %v1327_v63, %v1258_v58  ;;  %v1292_v25 = vadd.f32 %v1291_v56, %v1259_v60 }
 0x140   : > { %v1329_v5 = vadd.f32 %v1328_v16, %v1260_v9  ;;  %v1293_v8 = vadd.f32 %v1292_v25, %v1261_v46 }
 0x142   : > { %v1294_v17 = vrot.slane %v1293_v8, 4  ;;  %v1330_v34 = vadd.f32 %v1329_v5, %v1262_v52 }
 0x144   : > { %v1295_v20 = vadd.f32 %v1294_v17, %v1293_v8  ;;  %v1331_v29 = vrot.slane %v1330_v34, 4 }
 0x146   : > { %v1296_v13 = vrot.slane %v1295_v20, 2  ;;  %v1332_v18 = vadd.f32 %v1331_v29, %v1330_v34 }
 0x148   : > { %v1297_v43 = vadd.f32 %v1296_v13, %v1295_v20  ;;  %v1333_v62 = vrot.slane %v1332_v18, 2 }
 0x14a   : > { %v1298_v30 = vrot.slane %v1297_v43, 1  ;;  %v1334_v32 = vadd.f32 %v1333_v62, %v1332_v18 }
 0x14c   : > { %v1335_v4 = vrot.slane %v1334_v32, 1  ;;  %v1299_v26 = vadd.f32 %v1298_v30, %v1297_v43 }
 0x14e   : > { %v1336_v54 = vadd.f32 %v1335_v4, %v1334_v32 }
 0x150   : > { %v1337_v31 = vsub.f32 %v1299_v26, %v1336_v54 }
 0x152   : > { %v1338_v44 = vmul.f32 %v1337_v31, %v1337_v31 }
 0x154   : > { %v1343_v45 = vmul.f32 %v1341_v41, %v1338_v44 }
 0x156   : > { %v1344_v15 = vadd.f32 %v1343_v45, %v1339_v47 }
 0x158   : > { %v1346_v49 = vsel %vm1345_vm4, %v1344_v15, 0.0 }
 0x159   : > { %1347 = vadd.xlane.f32.xlu0 %v1346_v49 }
 0x1e2   : > { %v1348_v27 = vpop.xlane.xlu0 %1347 }
 0x1e3   : > { %v1349_v10 = vrot.slane %v1348_v27, 4 }
 0x1e5   : > { %v1350_v39 = vadd.f32 %v1349_v10, %v1348_v27 }
 0x1e7   : > { %v1351_v3 = vrot.slane %v1350_v39, 2 }
 0x1e9   : > { %v1352_v51 = vadd.f32 %v1351_v3, %v1350_v39 }
 0x1eb   : > { %v1353_v40 = vrot.slane %v1352_v51, 1 }
 0x1ed   : > { %v1354_v0 = vadd.f32 %v1353_v40, %v1352_v51 }
 0x1ef   : > { %1595 = vpush %v1354_v0 }
 0x220   : > { %s1596_s26 = spop %1595 }
 0x221   : > { %v1363_v50 = vstv %s1596_s26 }
 0x222   : > { %v1364_v28 = vmul.f32 %v1587_v23, %v1363_v50 }
 0x224   : > { %1365 = vst [vmem:[%s209_s21] sm:$0xff] %v1364_v28 }
 0x225   : > { %1666 = shalt.err (!%p1663_p5)
}
 0x226   : > { %s1667_s7 = scalar_lea.hbm %s1378_s29, 128  ;;  %s1671_s10 = scalar_lea.hbm %s2370_s3, 256 }
 0x227   : > { %p1668_p6 = scmp.ne.s32.totalorder %s1378_s29, %s1667_s7  ;;  %p1672_p10 = scmp.lt.s32.totalorder %s1378_s29, %s2370_s3 }
 0x228   : > { %p1673_p11 = scmp.lt.s32.totalorder %s1671_s10, %s1667_s7 }
 0x229   : > { %p1669_p7 = pnand %p1668_p6, %p1793_p4 }
 0x22a   : > { %p1674_p12 = por %p1673_p11, %p1672_p10 }
 0x22b   : > { %p1670_p9 = pneg %p1669_p7 }
 0x22d   : > { %p1675_p13 = pnand %p1674_p12, %p1670_p9 }
 0x22f   : > { %1678 = shalt.err (!%p1675_p13)
}
 0x230   : > { %1597 = dma.vmem_to_hbm [thread:$0]  (%p1793_p4), %s1381_s23, 128, %s1378_s29, %s1367_s30  }
 0x231 PF: > { %p1603_p0 = scmp.ge.s32.totalorder %s1729_s17, 2  ;;  %s1392_s19 = sand.u32 1, %s1709_s12  }
 0x232   : > { %s1393_s21 = scalar_lea.sflag [#allocation4], %s1392_s19 }
 0x233   : > { %p1600_p1 = pnand %p1603_p0, %p1800_p8 }
 0x235   : > { %p1601_p2 = pneg %p1600_p1 }
 0x237   : > { %1704 = dma.done.wait (%p1601_p2), %s1393_s21, 128  }
 0x238   : > { %1706 = vsyncadd (%p1601_p2), %s1393_s21, 4294967168  ;;  %s16_s17 = sadd.s32 1, %s1729_s17   ;;  %s2375_s12 = smov %s1713_s13 }
 0x239   : > { %p13_p3 = scmp.ge.s32.totalorder %s16_s17, 4   ;;  %s2376_s13 = smov %s1717_s14 }
 0x23a   : > { %s2377_s14 = smov %s1806_s25  ;;  %s2378_s15 = smov %s1725_s16 }
 0x23b   : > { %s2379_s16 = smov %s2381_s20  ;;  %15 = sbr.rel (!%p13_p3) target bundleno = 4 (0x4), region = 81 }
 0x240   :  { %1398 = vsyncpa [#allocation4], 1 }
 0x241   :  { %1400 = vsyncpa [#allocation4 + $0x1], 1 }

</bundles_post_ra>
